<compile_context>
chip_gen: v5e
topology: v5e:2x2
jax: 0.10.0
libtpu: 0.0.40
codegen_flags: <defaults>
</compile_context>

<pallas_src>
import functools

import jax
import jax.numpy as jnp
from jax.experimental import pallas as pl
from jax.experimental.pallas import tpu as pltpu

EPS = 1e-5  # PyTorch InstanceNorm2d default eps


def _instance_norm(h, gamma, beta, inv_hw):
    # h: (rows, HW); per-row stats over the spatial (lane) axis, one pass.
    s = jnp.sum(h, axis=1, keepdims=True)
    s2 = jnp.sum(h * h, axis=1, keepdims=True)
    mean = s * inv_hw
    var = s2 * inv_hw - mean * mean          # biased variance (PyTorch IN)
    return (h - mean) * jax.lax.rsqrt(var + EPS) * gamma + beta


def _shc_kernel(shifts, pch, n_groups, inv_hw,
                x_ref, sc_ref, m_ref, w1_ref, w2_ref, w3_ref, p_ref, o_ref):
    B = x_ref.shape[0]

    # Tiny resident operands, loaded once per grid step.
    prm = p_ref[...]                       # (PACK*C, 6) packed gamma/beta
    g1, be1 = prm[:pch, 0:1], prm[:pch, 1:2]
    g2, be2 = prm[:pch, 2:3], prm[:pch, 3:4]
    g3, be3 = prm[:, 4:5], prm[:, 5:6]
    w1 = w1_ref[...]                       # (PACK*Ch, PACK*2C)   block-diag
    w2 = w2_ref[...]                       # (PACK*Ch, 9*PACK*Ch) block-diag/tap
    w3 = w3_ref[...]                       # (PACK*C,  PACK*Ch)   block-diag
    masks = m_ref[...]                     # (9, HW) border masks (0/1 f32)

    def body(b, carry):
        x = x_ref[b]                       # (PACK*2C, HW)

        # conv1: 1x1 conv == block-diag matmul, + IN + ReLU (bias cancels in IN)
        h = jnp.dot(w1, x, preferred_element_type=jnp.float32)
        h = jnp.maximum(_instance_norm(h, g1, be1, inv_hw), 0.0)

        # conv2: 3x3 pad=1 as ONE matmul over an in-register stack of the 9
        # rolled, border-masked taps (dense K, no VMEM round-trip).
        cols = []
        for k, shift in enumerate(shifts):
            hk = h if shift == 0 else pltpu.roll(h, shift=shift, axis=1)
            if shift != 0:
                hk = hk * masks[k:k + 1, :]   # center tap needs no mask
            cols.append(hk)
        col = jnp.concatenate(cols, axis=0)   # (9*PACK*Ch, HW), registers only
        h = jnp.dot(w2, col, preferred_element_type=jnp.float32)
        h = jnp.maximum(_instance_norm(h, g2, be2, inv_hw), 0.0)

        # conv3: 1x1 conv + IN (no activation), then residual add.
        h = jnp.dot(w3, h, preferred_element_type=jnp.float32)
        h = _instance_norm(h, g3, be3, inv_hw)
        o_ref[b] = h + sc_ref[b]              # lane-dense store
        return carry

    if n_groups % B == 0:
        jax.lax.fori_loop(0, B, body, 0)
    else:
        # Guarded tail: skip the padded groups of the last (partial) block.
        n_valid = jnp.minimum(B, n_groups - pl.program_id(0) * B)
        jax.lax.fori_loop(0, n_valid, body, 0)


def shc_forward(x_nchw, shortcut_nchw, params, *, pairs_per_step=None):
    N, C2, H, W = x_nchw.shape
    C = shortcut_nchw.shape[1]
    Ch = C // 2
    HW = H * W

    (w1, _b1, g1, be1, w2, _b2, g2, be2, w3, _b3, g3, be3) = params
    # Conv biases are added immediately before InstanceNorm -> they cancel
    # exactly in the mean subtraction, so they are dropped (dead work).

    # ---- sample-pair packing along the channel/sublane axis ----------------
    PACK = max(1, 8 // max(Ch, 1))           # fill the 8-sublane vreg tile
    Np = ((N + PACK - 1) // PACK) * PACK

    x = x_nchw.reshape(N, C2, HW).astype(jnp.float32)
    sc = shortcut_nchw.reshape(N, C, HW).astype(jnp.float32)
    if Np != N:
        x = jnp.pad(x, ((0, Np - N), (0, 0), (0, 0)))
        sc = jnp.pad(sc, ((0, Np - N), (0, 0), (0, 0)))
    n_groups = Np // PACK
    xg = x.reshape(n_groups, PACK * C2, HW)    # free reshapes (contiguous)
    scg = sc.reshape(n_groups, PACK * C, HW)

    # ---- host-side weight packing (tiny, one-time) --------------------------
    def bd(wmat):                              # (o,i) -> block_diag x PACK
        o, i = wmat.shape
        out = jnp.zeros((PACK * o, PACK * i), jnp.float32)
        for s in range(PACK):
            out = out.at[s * o:(s + 1) * o, s * i:(s + 1) * i].set(wmat)
        return out

    w1_bd = bd(w1[:, :, 0, 0].astype(jnp.float32))          # (P*Ch, P*2C)
    w3_bd = bd(w3[:, :, 0, 0].astype(jnp.float32))          # (P*C,  P*Ch)
    w2_taps = w2.astype(jnp.float32).transpose(2, 3, 0, 1).reshape(9, Ch, Ch)
    w2_bd = jnp.concatenate([bd(w2_taps[k]) for k in range(9)], axis=1)

    PCh = PACK * Ch
    PC = PACK * C
    P = jnp.zeros((PC, 6), jnp.float32)
    P = P.at[:PCh, 0].set(jnp.tile(g1.astype(jnp.float32), PACK))
    P = P.at[:PCh, 1].set(jnp.tile(be1.astype(jnp.float32), PACK))
    P = P.at[:PCh, 2].set(jnp.tile(g2.astype(jnp.float32), PACK))
    P = P.at[:PCh, 3].set(jnp.tile(be2.astype(jnp.float32), PACK))
    P = P.at[:, 4].set(jnp.tile(g3.astype(jnp.float32), PACK))
    P = P.at[:, 5].set(jnp.tile(be3.astype(jnp.float32), PACK))

    # ---- host-side border masks + roll shifts for the 9 taps ----------------
    pos = jnp.arange(HW, dtype=jnp.int32)
    r, c = pos // W, pos % W
    masks, shifts = [], []
    for dy in (-1, 0, 1):
        for dx in (-1, 0, 1):
            valid = ((r + dy >= 0) & (r + dy < H) &
                     (c + dx >= 0) & (c + dx < W))
            masks.append(valid.astype(jnp.float32))
            shifts.append(int((-(dy * W + dx)) % HW))
    masks = jnp.stack(masks, axis=0)                          # (9, HW)
    shifts = tuple(shifts)

    # ---- block size from a VMEM budget (double-buffered in + sc + out) ------
    bytes_per_group = 2 * (PACK * C2 + 2 * PACK * C) * HW * 4
    budget = 24 << 20                      # safe under v7x 32 MiB scoped default
    if pairs_per_step is None:
        b_vmem = max(1, budget // bytes_per_group)
        b_steps = max(1, pl.cdiv(n_groups, 8))   # target ~8 grid steps
        B = int(max(1, min(b_vmem, b_steps, n_groups)))
    else:
        B = int(max(1, min(pairs_per_step, n_groups)))
    n_steps = pl.cdiv(n_groups, B)

    consts_bytes = 4 * (masks.size + w1_bd.size + w2_bd.size + w3_bd.size + P.size)
    vmem_limit = int(min(60 << 20,
                         max(32 << 20, B * bytes_per_group + consts_bytes + (8 << 20))))

    kernel = functools.partial(_shc_kernel, shifts, PCh, n_groups, 1.0 / HW)

    def resident(shape):
        return pl.BlockSpec(shape, lambda n: (0,) * len(shape))

    out = pl.pallas_call(
        kernel,
        out_shape=jax.ShapeDtypeStruct((n_groups, PC, HW), jnp.float32),
        grid=(n_steps,),
        in_specs=[
            pl.BlockSpec((B, PACK * C2, HW), lambda n: (n, 0, 0)),
            pl.BlockSpec((B, PC, HW), lambda n: (n, 0, 0)),
            resident((9, HW)),
            resident(w1_bd.shape),
            resident(w2_bd.shape),
            resident(w3_bd.shape),
            resident(P.shape),
        ],
        out_specs=pl.BlockSpec((B, PC, HW), lambda n: (n, 0, 0)),
        compiler_params=pltpu.CompilerParams(
            dimension_semantics=("parallel",),
            vmem_limit_bytes=vmem_limit),
    )(xg, scg, masks, w1_bd, w2_bd, w3_bd, P)

    out = out.reshape(Np, C, H, W)
    return out[:N] if Np != N else out


# ---------------- pure-JAX reference (NCHW, mirrors the PyTorch module) ------
def _conv2d_ref(x, w, b, pad):
    y = jax.lax.conv_general_dilated(
        x, w, window_strides=(1, 1),
        padding=[(pad, pad), (pad, pad)],
        dimension_numbers=("NCHW", "OIHW", "NCHW"))
    return y + b[None, :, None, None]


def _inorm_ref(y, gamma, beta):
    mean = y.mean(axis=(2, 3), keepdims=True)
    var = ((y - mean) ** 2).mean(axis=(2, 3), keepdims=True)
    return ((y - mean) * jax.lax.rsqrt(var + EPS)
            * gamma[None, :, None, None] + beta[None, :, None, None])


def shc_ref(x, sc, params):
    (w1, b1, g1, be1, w2, b2, g2, be2, w3, b3, g3, be3) = params
    h = jax.nn.relu(_inorm_ref(_conv2d_ref(x, w1, b1, 0), g1, be1))
    h = jax.nn.relu(_inorm_ref(_conv2d_ref(h, w2, b2, 1), g2, be2))
    h = _inorm_ref(_conv2d_ref(h, w3, b3, 0), g3, be3)
    return h + sc


if __name__ == "__main__":
    N, C, H, W = 2, 8, 16, 16           # SHC(channel=8): x has 2C=16 channels
    Ch = C // 2
    key = jax.random.PRNGKey(0)
    ks = jax.random.split(key, 16)

    x = jax.random.normal(ks[0], (N, 2 * C, H, W), jnp.float32)
    shortcut = jax.random.normal(ks[1], (N, C, H, W), jnp.float32)

    def pinit(k, shape, scale=0.1):
        return scale * jax.random.normal(k, shape, jnp.float32)

    params = (
        # conv1: Conv2d(2C -> C/2, 1x1) + InstanceNorm(C/2, affine)
        pinit(ks[2], (Ch, 2 * C, 1, 1)), pinit(ks[3], (Ch,)),
        1.0 + pinit(ks[4], (Ch,)), pinit(ks[5], (Ch,)),
        # conv2: Conv2d(C/2 -> C/2, 3x3, pad=1) + InstanceNorm(C/2, affine)
        pinit(ks[6], (Ch, Ch, 3, 3)), pinit(ks[7], (Ch,)),
        1.0 + pinit(ks[8], (Ch,)), pinit(ks[9], (Ch,)),
        # conv3: Conv2d(C/2 -> C, 1x1) + InstanceNorm(C, affine), no activation
        pinit(ks[10], (C, Ch, 1, 1)), pinit(ks[11], (C,)),
        1.0 + pinit(ks[12], (C,)), pinit(ks[13], (C,)),
    )

    out = shc_forward(x, shortcut, params)
    out = jax.block_until_ready(out)

    ref = shc_ref(x, shortcut, params)
    err = float(jnp.max(jnp.abs(out - ref)))
    assert out.shape == shortcut.shape, (out.shape, shortcut.shape)
    if err > 5e-2:
        raise SystemExit(f"mismatch vs reference: max abs err = {err}")
    print("KERNEL_OK")
</pallas_src>

<mosaic_0001>
module attributes {stable_mosaic.version = 11 : i64} {
  func.func @_shc_kernel(%arg0: i32, %arg1: memref<1x32x256xf32, #tpu.memory_space<vmem>>, %arg2: memref<1x16x256xf32, #tpu.memory_space<vmem>>, %arg3: memref<9x256xf32, #tpu.memory_space<vmem>>, %arg4: memref<8x32xf32, #tpu.memory_space<vmem>>, %arg5: memref<8x72xf32, #tpu.memory_space<vmem>>, %arg6: memref<16x8xf32, #tpu.memory_space<vmem>>, %arg7: memref<16x6xf32, #tpu.memory_space<vmem>>, %arg8: memref<1x16x256xf32, #tpu.memory_space<vmem>>) attributes {dimension_semantics = [#tpu.dimension_semantics<parallel>], iteration_bounds = array<i64: 1>, scalar_prefetch = 0 : i64, scratch_operands = 0 : i64, tpu.core_type = #tpu.core_type<tc>, window_params = [{transform_indices = @transform_0, window_bounds = array<i64: 1, 32, 256>}, {transform_indices = @transform_1, window_bounds = array<i64: 1, 16, 256>}, {pipeline_mode = #tpu.pipeline_mode<synchronous>, transform_indices = @transform_2, window_bounds = array<i64: 9, 256>}, {pipeline_mode = #tpu.pipeline_mode<synchronous>, transform_indices = @transform_3, window_bounds = array<i64: 8, 32>}, {pipeline_mode = #tpu.pipeline_mode<synchronous>, transform_indices = @transform_4, window_bounds = array<i64: 8, 72>}, {pipeline_mode = #tpu.pipeline_mode<synchronous>, transform_indices = @transform_5, window_bounds = array<i64: 16, 8>}, {pipeline_mode = #tpu.pipeline_mode<synchronous>, transform_indices = @transform_6, window_bounds = array<i64: 16, 6>}, {transform_indices = @transform_7, window_bounds = array<i64: 1, 16, 256>}]} {
    %c0 = arith.constant 0 : index
    %c0_0 = arith.constant 0 : index
    %0 = vector.load %arg7[%c0, %c0_0] : memref<16x6xf32, #tpu.memory_space<vmem>>, vector<16x6xf32>
    %1 = vector.extract_strided_slice %0 {offsets = [0, 0], sizes = [8, 1], strides = [1, 1]} : vector<16x6xf32> to vector<8x1xf32>
    %2 = vector.extract_strided_slice %0 {offsets = [0, 1], sizes = [8, 1], strides = [1, 1]} : vector<16x6xf32> to vector<8x1xf32>
    %3 = vector.extract_strided_slice %0 {offsets = [0, 2], sizes = [8, 1], strides = [1, 1]} : vector<16x6xf32> to vector<8x1xf32>
    %4 = vector.extract_strided_slice %0 {offsets = [0, 3], sizes = [8, 1], strides = [1, 1]} : vector<16x6xf32> to vector<8x1xf32>
    %5 = vector.extract_strided_slice %0 {offsets = [0, 4], sizes = [16, 1], strides = [1, 1]} : vector<16x6xf32> to vector<16x1xf32>
    %6 = vector.extract_strided_slice %0 {offsets = [0, 5], sizes = [16, 1], strides = [1, 1]} : vector<16x6xf32> to vector<16x1xf32>
    %c0_1 = arith.constant 0 : index
    %c0_2 = arith.constant 0 : index
    %7 = vector.load %arg4[%c0_1, %c0_2] : memref<8x32xf32, #tpu.memory_space<vmem>>, vector<8x32xf32>
    %c0_3 = arith.constant 0 : index
    %c0_4 = arith.constant 0 : index
    %8 = vector.load %arg5[%c0_3, %c0_4] : memref<8x72xf32, #tpu.memory_space<vmem>>, vector<8x72xf32>
    %c0_5 = arith.constant 0 : index
    %c0_6 = arith.constant 0 : index
    %9 = vector.load %arg6[%c0_5, %c0_6] : memref<16x8xf32, #tpu.memory_space<vmem>>, vector<16x8xf32>
    %c0_7 = arith.constant 0 : index
    %c0_8 = arith.constant 0 : index
    %10 = vector.load %arg3[%c0_7, %c0_8] : memref<9x256xf32, #tpu.memory_space<vmem>>, vector<9x256xf32>
    %c0_i32 = arith.constant 0 : i32
    %11 = arith.index_cast %c0_i32 : i32 to index
    %c0_9 = arith.constant 0 : index
    %c0_10 = arith.constant 0 : index
    %12 = vector.load %arg1[%11, %c0_9, %c0_10] : memref<1x32x256xf32, #tpu.memory_space<vmem>>, vector<1x32x256xf32>
    %13 = vector.shape_cast %12 : vector<1x32x256xf32> to vector<32x256xf32>
    %cst = arith.constant dense<0.000000e+00> : vector<8x256xf32>
    %14 = tpu.matmul %7, %13, %cst {dimension_numbers = #tpu.dot_dimension_numbers<[1], [0], [0], [1], [0, 0, 1, 1], [], []>} : vector<8x32xf32>, vector<32x256xf32>, vector<8x256xf32> -> vector<8x256xf32>
    %cst_11 = arith.constant dense<0.000000e+00> : vector<8xf32>
    %15 = vector.multi_reduction <add>, %14, %cst_11 [1] : vector<8x256xf32> to vector<8xf32>
    %16 = vector.shape_cast %15 : vector<8xf32> to vector<8x1xf32>
    %17 = arith.mulf %14, %14 : vector<8x256xf32>
    %cst_12 = arith.constant dense<0.000000e+00> : vector<8xf32>
    %18 = vector.multi_reduction <add>, %17, %cst_12 [1] : vector<8x256xf32> to vector<8xf32>
    %19 = vector.shape_cast %18 : vector<8xf32> to vector<8x1xf32>
    %cst_13 = arith.constant 3.906250e-03 : f32
    %20 = vector.broadcast %cst_13 : f32 to vector<8x1xf32>
    %21 = arith.mulf %16, %20 : vector<8x1xf32>
    %cst_14 = arith.constant 3.906250e-03 : f32
    %22 = vector.broadcast %cst_14 : f32 to vector<8x1xf32>
    %23 = arith.mulf %19, %22 : vector<8x1xf32>
    %24 = arith.mulf %21, %21 : vector<8x1xf32>
    %25 = arith.subf %23, %24 : vector<8x1xf32>
    %26 = vector.broadcast %21 : vector<8x1xf32> to vector<8x256xf32>
    %27 = arith.subf %14, %26 : vector<8x256xf32>
    %cst_15 = arith.constant 9.99999974E-6 : f32
    %28 = vector.broadcast %cst_15 : f32 to vector<8x1xf32>
    %29 = arith.addf %25, %28 : vector<8x1xf32>
    %30 = math.rsqrt %29 : vector<8x1xf32>
    %31 = vector.broadcast %30 : vector<8x1xf32> to vector<8x256xf32>
    %32 = arith.mulf %27, %31 : vector<8x256xf32>
    %33 = vector.broadcast %1 : vector<8x1xf32> to vector<8x256xf32>
    %34 = arith.mulf %32, %33 : vector<8x256xf32>
    %35 = vector.broadcast %2 : vector<8x1xf32> to vector<8x256xf32>
    %36 = arith.addf %34, %35 : vector<8x256xf32>
    %cst_16 = arith.constant 0.000000e+00 : f32
    %37 = vector.broadcast %cst_16 : f32 to vector<8x256xf32>
    %38 = arith.maximumf %36, %37 : vector<8x256xf32>
    %c17_i32 = arith.constant 17 : i32
    %39 = tpu.dynamic_rotate %38 by %c17_i32 dim 1 : vector<8x256xf32>, i32 -> vector<8x256xf32>
    %40 = vector.extract_strided_slice %10 {offsets = [0, 0], sizes = [1, 256], strides = [1, 1]} : vector<9x256xf32> to vector<1x256xf32>
    %41 = vector.broadcast %40 : vector<1x256xf32> to vector<8x256xf32>
    %42 = arith.mulf %39, %41 : vector<8x256xf32>
    %c16_i32 = arith.constant 16 : i32
    %43 = tpu.dynamic_rotate %38 by %c16_i32 dim 1 : vector<8x256xf32>, i32 -> vector<8x256xf32>
    %44 = vector.extract_strided_slice %10 {offsets = [1, 0], sizes = [1, 256], strides = [1, 1]} : vector<9x256xf32> to vector<1x256xf32>
    %45 = vector.broadcast %44 : vector<1x256xf32> to vector<8x256xf32>
    %46 = arith.mulf %43, %45 : vector<8x256xf32>
    %c15_i32 = arith.constant 15 : i32
    %47 = tpu.dynamic_rotate %38 by %c15_i32 dim 1 : vector<8x256xf32>, i32 -> vector<8x256xf32>
    %48 = vector.extract_strided_slice %10 {offsets = [2, 0], sizes = [1, 256], strides = [1, 1]} : vector<9x256xf32> to vector<1x256xf32>
    %49 = vector.broadcast %48 : vector<1x256xf32> to vector<8x256xf32>
    %50 = arith.mulf %47, %49 : vector<8x256xf32>
    %c1_i32 = arith.constant 1 : i32
    %51 = tpu.dynamic_rotate %38 by %c1_i32 dim 1 : vector<8x256xf32>, i32 -> vector<8x256xf32>
    %52 = vector.extract_strided_slice %10 {offsets = [3, 0], sizes = [1, 256], strides = [1, 1]} : vector<9x256xf32> to vector<1x256xf32>
    %53 = vector.broadcast %52 : vector<1x256xf32> to vector<8x256xf32>
    %54 = arith.mulf %51, %53 : vector<8x256xf32>
    %c255_i32 = arith.constant 255 : i32
    %55 = tpu.dynamic_rotate %38 by %c255_i32 dim 1 : vector<8x256xf32>, i32 -> vector<8x256xf32>
    %56 = vector.extract_strided_slice %10 {offsets = [5, 0], sizes = [1, 256], strides = [1, 1]} : vector<9x256xf32> to vector<1x256xf32>
    %57 = vector.broadcast %56 : vector<1x256xf32> to vector<8x256xf32>
    %58 = arith.mulf %55, %57 : vector<8x256xf32>
    %c241_i32 = arith.constant 241 : i32
    %59 = tpu.dynamic_rotate %38 by %c241_i32 dim 1 : vector<8x256xf32>, i32 -> vector<8x256xf32>
    %60 = vector.extract_strided_slice %10 {offsets = [6, 0], sizes = [1, 256], strides = [1, 1]} : vector<9x256xf32> to vector<1x256xf32>
    %61 = vector.broadcast %60 : vector<1x256xf32> to vector<8x256xf32>
    %62 = arith.mulf %59, %61 : vector<8x256xf32>
    %c240_i32 = arith.constant 240 : i32
    %63 = tpu.dynamic_rotate %38 by %c240_i32 dim 1 : vector<8x256xf32>, i32 -> vector<8x256xf32>
    %64 = vector.extract_strided_slice %10 {offsets = [7, 0], sizes = [1, 256], strides = [1, 1]} : vector<9x256xf32> to vector<1x256xf32>
    %65 = vector.broadcast %64 : vector<1x256xf32> to vector<8x256xf32>
    %66 = arith.mulf %63, %65 : vector<8x256xf32>
    %c239_i32 = arith.constant 239 : i32
    %67 = tpu.dynamic_rotate %38 by %c239_i32 dim 1 : vector<8x256xf32>, i32 -> vector<8x256xf32>
    %68 = vector.extract_strided_slice %10 {offsets = [8, 0], sizes = [1, 256], strides = [1, 1]} : vector<9x256xf32> to vector<1x256xf32>
    %69 = vector.broadcast %68 : vector<1x256xf32> to vector<8x256xf32>
    %70 = arith.mulf %67, %69 : vector<8x256xf32>
    %71 = tpu.concatenate %42, %46, %50, %54, %38, %58, %62, %66, %70 in 0 : vector<8x256xf32>, vector<8x256xf32>, vector<8x256xf32>, vector<8x256xf32>, vector<8x256xf32>, vector<8x256xf32>, vector<8x256xf32>, vector<8x256xf32>, vector<8x256xf32> -> vector<72x256xf32>
    %cst_17 = arith.constant dense<0.000000e+00> : vector<8x256xf32>
    %72 = tpu.matmul %8, %71, %cst_17 {dimension_numbers = #tpu.dot_dimension_numbers<[1], [0], [0], [1], [0, 0, 1, 1], [], []>} : vector<8x72xf32>, vector<72x256xf32>, vector<8x256xf32> -> vector<8x256xf32>
    %cst_18 = arith.constant dense<0.000000e+00> : vector<8xf32>
    %73 = vector.multi_reduction <add>, %72, %cst_18 [1] : vector<8x256xf32> to vector<8xf32>
    %74 = vector.shape_cast %73 : vector<8xf32> to vector<8x1xf32>
    %75 = arith.mulf %72, %72 : vector<8x256xf32>
    %cst_19 = arith.constant dense<0.000000e+00> : vector<8xf32>
    %76 = vector.multi_reduction <add>, %75, %cst_19 [1] : vector<8x256xf32> to vector<8xf32>
    %77 = vector.shape_cast %76 : vector<8xf32> to vector<8x1xf32>
    %cst_20 = arith.constant 3.906250e-03 : f32
    %78 = vector.broadcast %cst_20 : f32 to vector<8x1xf32>
    %79 = arith.mulf %74, %78 : vector<8x1xf32>
    %cst_21 = arith.constant 3.906250e-03 : f32
    %80 = vector.broadcast %cst_21 : f32 to vector<8x1xf32>
    %81 = arith.mulf %77, %80 : vector<8x1xf32>
    %82 = arith.mulf %79, %79 : vector<8x1xf32>
    %83 = arith.subf %81, %82 : vector<8x1xf32>
    %84 = vector.broadcast %79 : vector<8x1xf32> to vector<8x256xf32>
    %85 = arith.subf %72, %84 : vector<8x256xf32>
    %cst_22 = arith.constant 9.99999974E-6 : f32
    %86 = vector.broadcast %cst_22 : f32 to vector<8x1xf32>
    %87 = arith.addf %83, %86 : vector<8x1xf32>
    %88 = math.rsqrt %87 : vector<8x1xf32>
    %89 = vector.broadcast %88 : vector<8x1xf32> to vector<8x256xf32>
    %90 = arith.mulf %85, %89 : vector<8x256xf32>
    %91 = vector.broadcast %3 : vector<8x1xf32> to vector<8x256xf32>
    %92 = arith.mulf %90, %91 : vector<8x256xf32>
    %93 = vector.broadcast %4 : vector<8x1xf32> to vector<8x256xf32>
    %94 = arith.addf %92, %93 : vector<8x256xf32>
    %cst_23 = arith.constant 0.000000e+00 : f32
    %95 = vector.broadcast %cst_23 : f32 to vector<8x256xf32>
    %96 = arith.maximumf %94, %95 : vector<8x256xf32>
    %cst_24 = arith.constant dense<0.000000e+00> : vector<16x256xf32>
    %97 = tpu.matmul %9, %96, %cst_24 {dimension_numbers = #tpu.dot_dimension_numbers<[1], [0], [0], [1], [0, 0, 1, 1], [], []>} : vector<16x8xf32>, vector<8x256xf32>, vector<16x256xf32> -> vector<16x256xf32>
    %cst_25 = arith.constant dense<0.000000e+00> : vector<16xf32>
    %98 = vector.multi_reduction <add>, %97, %cst_25 [1] : vector<16x256xf32> to vector<16xf32>
    %99 = vector.shape_cast %98 : vector<16xf32> to vector<16x1xf32>
    %100 = arith.mulf %97, %97 : vector<16x256xf32>
    %cst_26 = arith.constant dense<0.000000e+00> : vector<16xf32>
    %101 = vector.multi_reduction <add>, %100, %cst_26 [1] : vector<16x256xf32> to vector<16xf32>
    %102 = vector.shape_cast %101 : vector<16xf32> to vector<16x1xf32>
    %cst_27 = arith.constant 3.906250e-03 : f32
    %103 = vector.broadcast %cst_27 : f32 to vector<16x1xf32>
    %104 = arith.mulf %99, %103 : vector<16x1xf32>
    %cst_28 = arith.constant 3.906250e-03 : f32
    %105 = vector.broadcast %cst_28 : f32 to vector<16x1xf32>
    %106 = arith.mulf %102, %105 : vector<16x1xf32>
    %107 = arith.mulf %104, %104 : vector<16x1xf32>
    %108 = arith.subf %106, %107 : vector<16x1xf32>
    %109 = vector.broadcast %104 : vector<16x1xf32> to vector<16x256xf32>
    %110 = arith.subf %97, %109 : vector<16x256xf32>
    %cst_29 = arith.constant 9.99999974E-6 : f32
    %111 = vector.broadcast %cst_29 : f32 to vector<16x1xf32>
    %112 = arith.addf %108, %111 : vector<16x1xf32>
    %113 = math.rsqrt %112 : vector<16x1xf32>
    %114 = vector.broadcast %113 : vector<16x1xf32> to vector<16x256xf32>
    %115 = arith.mulf %110, %114 : vector<16x256xf32>
    %116 = vector.broadcast %5 : vector<16x1xf32> to vector<16x256xf32>
    %117 = arith.mulf %115, %116 : vector<16x256xf32>
    %118 = vector.broadcast %6 : vector<16x1xf32> to vector<16x256xf32>
    %119 = arith.addf %117, %118 : vector<16x256xf32>
    %120 = arith.index_cast %c0_i32 : i32 to index
    %c0_30 = arith.constant 0 : index
    %c0_31 = arith.constant 0 : index
    %121 = vector.load %arg2[%120, %c0_30, %c0_31] : memref<1x16x256xf32, #tpu.memory_space<vmem>>, vector<1x16x256xf32>
    %122 = vector.shape_cast %121 : vector<1x16x256xf32> to vector<16x256xf32>
    %123 = arith.addf %119, %122 : vector<16x256xf32>
    %124 = arith.index_cast %c0_i32 : i32 to index
    %c0_32 = arith.constant 0 : index
    %c0_33 = arith.constant 0 : index
    %125 = vector.load %arg8[%124, %c0_32, %c0_33] : memref<1x16x256xf32, #tpu.memory_space<vmem>>, vector<1x16x256xf32>
    %126 = vector.shape_cast %125 : vector<1x16x256xf32> to vector<16x256xf32>
    %127 = vector.shape_cast %123 : vector<16x256xf32> to vector<1x16x256xf32>
    tpu.vector_store %arg8[%124, %c0_32, %c0_33], %127 {strides = array<i32>} : memref<1x16x256xf32, #tpu.memory_space<vmem>>, vector<1x16x256xf32>,
    %c1_i32_34 = arith.constant 1 : i32
    return
  }
  func.func @transform_0(%arg0: i32) -> (i32, i32, i32) {
    %c0_i32 = arith.constant 0 : i32
    %c0_i32_0 = arith.constant 0 : i32
    %c0_i32_1 = arith.constant 0 : i32
    return %arg0, %c0_i32, %c0_i32_0 : i32, i32, i32
  }
  func.func @transform_1(%arg0: i32) -> (i32, i32, i32) {
    %c0_i32 = arith.constant 0 : i32
    %c0_i32_0 = arith.constant 0 : i32
    %c0_i32_1 = arith.constant 0 : i32
    return %arg0, %c0_i32, %c0_i32_0 : i32, i32, i32
  }
  func.func @transform_2(%arg0: i32) -> (i32, i32) {
    %c0_i32 = arith.constant 0 : i32
    %c0_i32_0 = arith.constant 0 : i32
    %c0_i32_1 = arith.constant 0 : i32
    return %c0_i32, %c0_i32_0 : i32, i32
  }
  func.func @transform_3(%arg0: i32) -> (i32, i32) {
    %c0_i32 = arith.constant 0 : i32
    %c0_i32_0 = arith.constant 0 : i32
    %c0_i32_1 = arith.constant 0 : i32
    return %c0_i32, %c0_i32_0 : i32, i32
  }
  func.func @transform_4(%arg0: i32) -> (i32, i32) {
    %c0_i32 = arith.constant 0 : i32
    %c0_i32_0 = arith.constant 0 : i32
    %c0_i32_1 = arith.constant 0 : i32
    return %c0_i32, %c0_i32_0 : i32, i32
  }
  func.func @transform_5(%arg0: i32) -> (i32, i32) {
    %c0_i32 = arith.constant 0 : i32
    %c0_i32_0 = arith.constant 0 : i32
    %c0_i32_1 = arith.constant 0 : i32
    return %c0_i32, %c0_i32_0 : i32, i32
  }
  func.func @transform_6(%arg0: i32) -> (i32, i32) {
    %c0_i32 = arith.constant 0 : i32
    %c0_i32_0 = arith.constant 0 : i32
    %c0_i32_1 = arith.constant 0 : i32
    return %c0_i32, %c0_i32_0 : i32, i32
  }
  func.func @transform_7(%arg0: i32) -> (i32, i32, i32) {
    %c0_i32 = arith.constant 0 : i32
    %c0_i32_0 = arith.constant 0 : i32
    %c0_i32_1 = arith.constant 0 : i32
    return %arg0, %c0_i32, %c0_i32_0 : i32, i32, i32
  }
}

</mosaic_0001>

<bundles_post_ra>
// kernel: tpu_custom_call.1
= control target key start
LH: loop header
LB: loop body
LE: loop exit
PB: predicated region body
PF: predicated region fallthrough
CT: control target
= control target key end

     0   :  { %12 = vsyncpa [#allocation3], 0  ;;  %s841_s0 = inlined_call_operand.hbm [shape: f32[1,32,256], index: 0, kind: input, shape index: {}]   ;;  %s842_s1 = inlined_call_operand.vmem [shape: f32[1,16,256], index: 1, kind: input, shape index: {}]   ;;  %s843_s2 = inlined_call_operand.hbm [shape: f32[9,256], index: 2, kind: input, shape index: {}]   ;;  %s844_s3 = inlined_call_operand.vmem [shape: f32[8,32], index: 3, kind: input, shape index: {}]   ;;  %s845_s4 = inlined_call_operand.hbm [shape: f32[8,72], index: 4, kind: input, shape index: {}]   ;;  %s846_s5 = inlined_call_operand.vmem [shape: f32[16,8], index: 5, kind: input, shape index: {}]   ;;  %s847_s6 = inlined_call_operand.vmem [shape: f32[16,6], index: 6, kind: input, shape index: {}]   ;;  %s848_s7 = inlined_call_operand.hbm [shape: f32[1,16,256], index: 7, kind: output, shape index: {}]  }
   0x1   :  { %13 = vsyncpa [#allocation6], 0 }
   0x2   :  { %14 = vsyncpa [#allocation4], 0  ;;  %s34_s26 = sshll.u32 %s843_s2, 4  ;;  %s662_s27 = smov [#allocation5]   ;;  %s35_s26 = int_to_ptr.hbm [resolvable:$true] %s34_s26 }
   0x3   :  { %s36_s28 = sshll.u32 %s662_s27, 4  ;;  %s19_s8 = sshll.u32 %s841_s0, 4  ;;  %s37_s28 = int_to_ptr.vmem [resolvable:$true] %s36_s28  ;;  %s20_s8 = int_to_ptr.hbm [resolvable:$true] %s19_s8 }
   0x4   :  { %s663_s9 = smov 256   ;;  %s664_s10 = smov 16  }
   0x5   :  { %42 = dma.hbm_to_vmem [thread:$0]  %s35_s26, 512, %s37_s28, [#allocation6], %s663_s9, %s663_s9, %s664_s10  }
   0x6   :  { %s665_s11 = smov [#allocation2]   ;;  %s50_s2 = sshll.u32 %s845_s4, 4  ;;  %s51_s2 = int_to_ptr.hbm [resolvable:$true] %s50_s2 }
   0x7   :  { %s21_s12 = sshll.u32 %s665_s11, 4  ;;  %s666_s0 = smov [#allocation7]   ;;  %s22_s12 = int_to_ptr.vmem [resolvable:$true] %s21_s12 }
   0x8   :  { %27 = dma.hbm_to_vmem [thread:$0]  %s20_s8, 1024, %s22_s12, [#allocation3], %s663_s9, %s663_s9, %s664_s10  }
   0x9   :  { %s52_s15 = sshll.u32 %s666_s0, 4  ;;  %s53_s15 = int_to_ptr.vmem [resolvable:$true] %s52_s15 }
   0xa   :  { %55 = dma.hbm_to_vmem [thread:$0]  %s51_s2, 128, %s53_s15, [#allocation6]  }
   0xb   :  { %656 = dma.done.wait [#allocation3], 1024  }
   0xc   :  { %657 = vsyncadd [#allocation3], 4294966272 }
   0xd   :  { %658 = dma.done.wait [#allocation6], 640  }
   0xe   :  { %659 = vsyncadd [#allocation6], 4294966656  ;;  %v88_v0 = vld [vmem:[#allocation2 + $0x30] sm:$0xff]  ;;  %v89_v1 = vld [vmem:[#allocation2 + $0x38] sm:$0xff]  ;;  %vm90_vm0 = vcmask 261120   ;;  %v667_v10 = vmov 0   ;;  %v180_v44 = vlaneseq }
   0xf   :  { %v86_v2 = vld [vmem:[#allocation2 + $0x20] sm:$0xff]  ;;  %106 = vmatpush.msra.mxu0 %v88_v0  ;;  %126 = vmatpush.msra.mxu1 %v89_v1  ;;  %v87_v3 = vld [vmem:[#allocation2 + $0x28] sm:$0xff]  ;;  %v84_v4 = vld [vmem:[#allocation2 + $0x10] sm:$0xff]  ;;  %v668_v11 = vmov 1   ;;  %s670_s19 = smov 111   ;;  %s671_s20 = smov 113  }
  0x10   :  { %v85_v5 = vld [vmem:[#allocation2 + $0x18] sm:$0xff]  ;;  %v82_v6 = vld [vmem:[#allocation2] sm:$0xff]  ;;  %v83_v7 = vld [vmem:[#allocation2 + $0x8] sm:$0xff]  ;;  %542 = vset.pattern.permute.xlu1 %v667_v10  ;;  %s672_s21 = smov 1   ;;  %s673_s22 = smov 127   ;;  %v768_v46 = vand.u32 127, %v180_v44 }
  0x11   :  { %107 = vmatpush.msra.mxu0 %v86_v2  ;;  %127 = vmatpush.msra.mxu1 %v87_v3  ;;  %v74_v8 = vld [vmem:[%s844_s3] sm:$0xff]  ;;  %s669_s3 = smov 112   ;;  %s674_s23 = smov 15   ;;  %v550_v47 = vld [vmem:[#allocation5 + $0x10] ss:$0 sm:$0xff]  ;;  %v773_v56 = vld [vmem:[#allocation5 + $0x8] sm:$0xff] }
  0x12   :  { %v742_v9 = vld [vmem:[%s847_s6] sm:$0xff]  ;;  %s675_s24 = smov 17   ;;  %vm259_vm4 = vcmp.lt.s32.totalorder %v768_v46, 111  ;;  %v551_v48 = vld [vmem:[#allocation5 + $0x18] ss:$0 sm:$0xff]  ;;  %vm248_vm5 = vcmp.lt.s32.totalorder %v768_v46, 112 }
  0x13   :  { %108 = vmatpush.msra.mxu0 %v84_v4  ;;  %128 = vmatpush.msra.mxu1 %v85_v5  ;;  %v771_v55 = vld [vmem:[#allocation5] sm:$0xff]  ;;  %v252_v58 = vperm.slane %v773_v56, 7  ;;  %vm237_vm6 = vcmp.lt.s32.totalorder %v768_v46, 113  ;;  %v241_v3 = vperm.slane %v773_v56, 6  ;;  %vm226_vm7 = vcmp.lt.s32.totalorder %v768_v46, 127  ;;  %s680_s0 = smov [#allocation8]  }
  0x14   :  { %163 = vperm.xlu1 %542, %v742_v9   ;;  %v251_v57 = vperm.slane %v771_v55, 7  ;;  %v240_v2 = vperm.slane %v771_v55, 6  ;;  %vm215_vm8 = vcmp.lt.s32.totalorder %v768_v46, 1  ;;  %vm204_vm9 = vcmp.lt.s32.totalorder %v768_v46, 15  ;;  %s499_s15 = sshll.u32 %s680_s0, 4  ;;  %s501_s17 = sshll.u32 %s848_s7, 4  ;;  %s500_s15 = int_to_ptr.vmem [resolvable:$true] %s499_s15  ;;  %s502_s17 = int_to_ptr.hbm [resolvable:$true] %s501_s17 }
  0x15   :  { %109 = vmatpush.msra.mxu0 %v82_v6  ;;  %129 = vmatpush.msra.mxu1 %v83_v7  ;;  %vm182_vm10 = vcmp.lt.s32.totalorder %v768_v46, 17  ;;  %vm193_vm11 = vcmp.lt.s32.totalorder %v768_v46, 16  ;;  %v75_v46 = vld [vmem:[#allocation7] sm:$0xff]  ;;  %vm266_vm12 = vcmask 588800  }
  0x16   :  { %515 = vmatmul.msk.f32.vlgmr.msra.gmra.mxu0 %vm90_vm0, %v74_v8  ;;  %516 = vmatmul.msk.f32.vlgmr.msra.gmra.mxu1 %vm90_vm0, %v74_v8  ;;  %vm351_vm0 = vcmask 64512  }
  0x1c   :  { %543 = vset.pattern.permute.xlu1 %v668_v11 }
  0x1d   :  { %169 = vperm.xlu1 %543, %v742_v9  }
  0x86   :  { %v164_v28 = vpop.permute.xlu1 %163 }
  0x8f   :  { %v170_v37 = vpop.permute.xlu1 %169 }
  0x93   :  { %v111_v12 = vpop.f32.mrf.mxu0  ;;  %v131_v13 = vpop.f32.mrf.mxu1 }
  0x94   :  { %v134_v14 = vadd.f32 %v131_v13, %v111_v12  ;;  %v137_v15 = vmul.f32 %v111_v12, %v111_v12  ;;  %v138_v16 = vmul.f32 %v131_v13, %v131_v13 }
  0x96   :  { %135 = vadd.xlane.f32.xlu0 %v134_v14  ;;  %v139_v17 = vadd.f32 %v138_v16, %v137_v15 }
  0x9e   :  { %140 = vadd.xlane.f32.xlu0 %v139_v17 }
 0x109   :  { %v136_v18 = vpop.xlane.xlu0 %135 }
 0x10a   :  { %v142_v19 = vmul.f32 0.00390625, %v136_v18 }
 0x10c   :  { %v144_v21 = vmul.f32 %v142_v19, %v142_v19  ;;  %v146_v32 = vsub.f32 %v111_v12, %v142_v19  ;;  %v147_v33 = vsub.f32 %v131_v13, %v142_v19  ;;  %v229_v12 = vperm.slane %v771_v55, 5 }
 0x10d   :  { %v230_v13 = vperm.slane %v773_v56, 5  ;;  %v218_v19 = vperm.slane %v771_v55, 3 }
 0x111   :  { %v141_v20 = vpop.xlane.xlu0 %140 }
 0x112   :  { %v143_v22 = vmul.f32 0.00390625, %v141_v20  ;;  %v219_v20 = vperm.slane %v773_v56, 3 }
 0x114   :  { %v145_v23 = vsub.f32 %v143_v22, %v144_v21 }
 0x116   :  { %v148_v24 = vadd.f32 1e-05, %v145_v23 }
 0x118   :  { %552 = vrsqrt.f32 %v148_v24  ;;  %vm155_vm2 = vweird.f32 %v148_v24 }
 0x11e   :  { %v553_v25 = vpop.eup %552 }
 0x11f   :  { %v150_v26 = vmul.f32 %v553_v25, %v148_v24  ;;  %vm156_vm1 = vweird.f32 %v553_v25 }
 0x120   :  { %vm157_vm3 = vmor %vm155_vm2, %vm156_vm1 }
 0x121   :  { %v151_v27 = vmul.f32 %v553_v25, %v150_v26 }
 0x123   :  { %v152_v29 = vmul.f32 0.5, %v151_v27  ;;  %v207_v27 = vperm.slane %v771_v55, 2 }
 0x125   :  { %v153_v30 = vsub.f32 1.5, %v152_v29 }
 0x127   :  { %v154_v31 = vmul.f32 %v553_v25, %v153_v30 }
 0x129   :  { %v158_v34 = vsel %vm157_vm3, %v553_v25, %v154_v31 }
 0x12a   :  { %v159_v35 = vmul.f32 %v158_v34, %v146_v32  ;;  %v160_v36 = vmul.f32 %v158_v34, %v147_v33 }
 0x12c   :  { %v166_v38 = vmul.f32 %v164_v28, %v159_v35  ;;  %v167_v39 = vmul.f32 %v164_v28, %v160_v36  ;;  %v208_v28 = vperm.slane %v773_v56, 2  ;;  %v196_v36 = vperm.slane %v771_v55, 1 }
 0x12e   :  { %v172_v40 = vadd.f32 %v170_v37, %v166_v38  ;;  %v173_v41 = vadd.f32 %v170_v37, %v167_v39  ;;  %v197_v37 = vperm.slane %v773_v56, 1  ;;  %v185_v39 = vperm.slane %v771_v55, 0 }
 0x130   :  { %v746_v42 = vmax.f32 %v172_v40, 0.0  ;;  %v748_v43 = vmax.f32 %v173_v41, 0.0  ;;  %v186_v40 = vperm.slane %v773_v56, 0 }
 0x132   :  { %246 = vrot.lane.b32.xlu1 %v748_v43, %s669_s3  ;;  %244 = vrot.lane.b32.xlu0 %v746_v42, %s669_s3 }
 0x133   :  { %255 = vrot.lane.b32.xlu2 %v746_v42, %s670_s19 }
 0x13a   :  { %235 = vrot.lane.b32.xlu1 %v748_v43, %s671_s20  ;;  %213 = vrot.lane.b32.xlu0 %v748_v43, %s672_s21 }
 0x13b   :  { %257 = vrot.lane.b32.xlu2 %v748_v43, %s670_s19 }
 0x142   :  { %224 = vrot.lane.b32.xlu1 %v748_v43, %s673_s22  ;;  %189 = vrot.lane.b32.xlu0 %v746_v42, %s664_s10 }
 0x143   :  { %233 = vrot.lane.b32.xlu2 %v746_v42, %s671_s20 }
 0x14a   :  { %200 = vrot.lane.b32.xlu1 %v746_v42, %s674_s23  ;;  %178 = vrot.lane.b32.xlu0 %v748_v43, %s675_s24 }
 0x14b   :  { %222 = vrot.lane.b32.xlu2 %v746_v42, %s673_s22 }
 0x152   :  { %191 = vrot.lane.b32.xlu1 %v748_v43, %s664_s10 }
 0x153   :  { %211 = vrot.lane.b32.xlu2 %v746_v42, %s672_s21 }
 0x15b   :  { %202 = vrot.lane.b32.xlu2 %v748_v43, %s674_s23 }
 0x163   :  { %176 = vrot.lane.b32.xlu2 %v746_v42, %s675_s24 }
 0x18d   :  { %v256_v45 = vpop.permute.xlu2 %255 }
 0x195   :  { %v258_v49 = vpop.permute.xlu2 %257 }
 0x196   :  { %v260_v50 = vsel %vm259_vm4, %v256_v45, %v258_v49  ;;  %v261_v51 = vsel %vm259_vm4, %v258_v49, %v256_v45 }
 0x197   :  { %v264_v52 = vmul.f32 %v550_v47, %v260_v50  ;;  %v265_v53 = vmul.f32 %v551_v48, %v261_v51  ;;  %v676_v50 = vmov 2   ;;  %v677_v51 = vmov 3  }
 0x198   :  { %544 = vset.pattern.permute.xlu0 %v676_v50 }
 0x199   :  { %277 = vmatpush.msra.mxu2 %v264_v52  ;;  %297 = vmatpush.msra.mxu3 %v265_v53 }
 0x19a   :  { %338 = vperm.xlu0 %544, %v742_v9  }
 0x19d   :  { %v234_v54 = vpop.permute.xlu2 %233 }
 0x1a2   :  { %545 = vset.pattern.permute.xlu0 %v677_v51 }
 0x1a3   :  { %344 = vperm.xlu0 %545, %v742_v9  }
 0x1a4   :  { %v247_v59 = vpop.permute.xlu1 %246  ;;  %v245_v60 = vpop.permute.xlu0 %244 }
 0x1a5   :  { %v249_v61 = vsel %vm248_vm5, %v245_v60, %v247_v59  ;;  %v250_v62 = vsel %vm248_vm5, %v247_v59, %v245_v60  ;;  %v223_v63 = vpop.permute.xlu2 %222 }
 0x1a6   :  { %v253_v0 = vmul.f32 %v251_v57, %v249_v61  ;;  %v254_v1 = vmul.f32 %v252_v58, %v250_v62 }
 0x1a8   :  { %278 = vmatpush.msra.mxu2 %v253_v0  ;;  %298 = vmatpush.msra.mxu3 %v254_v1  ;;  %v678_v1 = vmov 4  }
 0x1a9   :  { %546 = vset.pattern.permute.xlu1 %v678_v1  ;;  %547 = vset.pattern.permute.xlu2 %v678_v1 }
 0x1ac   :  { %v236_v4 = vpop.permute.xlu1 %235  ;;  %v214_v7 = vpop.permute.xlu0 %213 }
 0x1ad   :  { %v238_v5 = vsel %vm237_vm6, %v234_v54, %v236_v4  ;;  %v239_v6 = vsel %vm237_vm6, %v236_v4, %v234_v54  ;;  %v212_v8 = vpop.permute.xlu2 %211 }
 0x1ae   :  { %v242_v10 = vmul.f32 %v240_v2, %v238_v5  ;;  %v243_v11 = vmul.f32 %v241_v3, %v239_v6  ;;  %v216_v21 = vsel %vm215_vm8, %v212_v8, %v214_v7  ;;  %v217_v22 = vsel %vm215_vm8, %v214_v7, %v212_v8 }
 0x1af   :  { %v220_v25 = vmul.f32 %v218_v19, %v217_v22  ;;  %v221_v26 = vmul.f32 %v219_v20, %v216_v21  ;;  %v76_v22 = vld [vmem:[%s846_s5] sm:$0xff] }
 0x1b0   :  { %279 = vmatpush.msra.mxu2 %v242_v10  ;;  %299 = vmatpush.msra.mxu3 %v243_v11 }
 0x1b4   :  { %v225_v14 = vpop.permute.xlu1 %224  ;;  %v190_v23 = vpop.permute.xlu0 %189 }
 0x1b5   :  { %v227_v15 = vsel %vm226_vm7, %v223_v63, %v225_v14  ;;  %v228_v16 = vsel %vm226_vm7, %v225_v14, %v223_v63  ;;  %v203_v24 = vpop.permute.xlu2 %202 }
 0x1b6   :  { %v231_v17 = vmul.f32 %v229_v12, %v227_v15  ;;  %v232_v18 = vmul.f32 %v230_v13, %v228_v16 }
 0x1b8   :  { %280 = vmatpush.msra.mxu2 %v231_v17  ;;  %300 = vmatpush.msra.mxu3 %v232_v18 }
 0x1ba   :  { %281 = vmatpush.msra.mxu2 %v746_v42  ;;  %301 = vmatpush.msra.mxu3 %v748_v43 }
 0x1bc   :  { %v201_v29 = vpop.permute.xlu1 %200  ;;  %282 = vmatpush.msra.mxu2 %v220_v25  ;;  %302 = vmatpush.msra.mxu3 %v221_v26  ;;  %v179_v34 = vpop.permute.xlu0 %178 }
 0x1bd   :  { %v205_v30 = vsel %vm204_vm9, %v201_v29, %v203_v24  ;;  %v206_v31 = vsel %vm204_vm9, %v203_v24, %v201_v29  ;;  %v177_v35 = vpop.permute.xlu2 %176  ;;  %v679_v24 = vmov 5  }
 0x1be   :  { %v209_v32 = vmul.f32 %v207_v27, %v206_v31  ;;  %v210_v33 = vmul.f32 %v208_v28, %v205_v30  ;;  %v183_v41 = vsel %vm182_vm10, %v177_v35, %v179_v34  ;;  %v184_v42 = vsel %vm182_vm10, %v179_v34, %v177_v35  ;;  %549 = vset.pattern.permute.xlu0 %v679_v24 }
 0x1bf   :  { %v187_v48 = vmul.f32 %v185_v39, %v184_v42  ;;  %v188_v49 = vmul.f32 %v186_v40, %v183_v41 }
 0x1c0   :  { %283 = vmatpush.msra.mxu2 %v209_v32  ;;  %303 = vmatpush.msra.mxu3 %v210_v33 }
 0x1c4   :  { %v192_v38 = vpop.permute.xlu1 %191 }
 0x1c5   :  { %v194_v43 = vsel %vm193_vm11, %v190_v23, %v192_v38  ;;  %v195_v44 = vsel %vm193_vm11, %v192_v38, %v190_v23  ;;  %v77_v23 = vld [vmem:[%s846_s5 + $0x8] sm:$0xff] }
 0x1c6   :  { %v198_v45 = vmul.f32 %v196_v36, %v195_v44  ;;  %v199_v47 = vmul.f32 %v197_v37, %v194_v43  ;;  %v73_v37 = vld [vmem:[%s847_s6 + $0x8] sm:$0xff] }
 0x1c8   :  { %284 = vmatpush.msra.mxu2 %v198_v45  ;;  %304 = vmatpush.msra.mxu3 %v199_v47 }
 0x1ca   :  { %285 = vmatpush.msra.mxu2 %v187_v48  ;;  %305 = vmatpush.msra.mxu3 %v188_v49 }
 0x1cb   :  { %517 = vmatmul.msk.f32.vlgmr.msra.gmra.mxu2 %vm266_vm12, %v75_v46  ;;  %518 = vmatmul.msk.f32.vlgmr.msra.gmra.mxu3 %vm266_vm12, %v75_v46 }
 0x20c   :  { %v339_v5 = vpop.permute.xlu0 %338 }
 0x215   :  { %v345_v15 = vpop.permute.xlu0 %344 }
 0x24e   :  { %v287_v52 = vpop.f32.mrf.mxu2  ;;  %v307_v53 = vpop.f32.mrf.mxu3 }
 0x24f   :  { %v313_v54 = vmul.f32 %v287_v52, %v287_v52  ;;  %v314_v55 = vmul.f32 %v307_v53, %v307_v53  ;;  %v310_v56 = vadd.f32 %v307_v53, %v287_v52 }
 0x251   :  { %311 = vadd.xlane.f32.xlu1 %v310_v56  ;;  %v315_v57 = vadd.f32 %v314_v55, %v313_v54 }
 0x253   :  { %316 = vadd.xlane.f32.xlu2 %v315_v57 }
 0x26a   :  { %459 = vperm.xlu1 %546, %v742_v9  }
 0x272   :  { %548 = vset.pattern.permute.xlu1 %v679_v24  ;;  %v485_v24 = vld [vmem:[%s842_s1 + $0x10] sm:$0xff] }
 0x2c4   :  { %v312_v58 = vpop.xlane.xlu1 %311 }
 0x2c5   :  { %v318_v59 = vmul.f32 0.00390625, %v312_v58 }
 0x2c6   :  { %v317_v60 = vpop.xlane.xlu2 %316 }
 0x2c7   :  { %v319_v61 = vmul.f32 0.00390625, %v317_v60  ;;  %v320_v62 = vmul.f32 %v318_v59, %v318_v59  ;;  %v322_v10 = vsub.f32 %v287_v52, %v318_v59  ;;  %v323_v11 = vsub.f32 %v307_v53, %v318_v59 }
 0x2c9   :  { %v321_v63 = vsub.f32 %v319_v61, %v320_v62 }
 0x2cb   :  { %v324_v0 = vadd.f32 1e-05, %v321_v63 }
 0x2cd   :  { %554 = vrsqrt.f32 %v324_v0  ;;  %vm331_vm14 = vweird.f32 %v324_v0 }
 0x2d3   :  { %v555_v2 = vpop.eup %554 }
 0x2d4   :  { %v326_v3 = vmul.f32 %v555_v2, %v324_v0  ;;  %vm332_vm13 = vweird.f32 %v555_v2 }
 0x2d5   :  { %vm333_vm15 = vmor %vm331_vm14, %vm332_vm13 }
 0x2d6   :  { %v327_v4 = vmul.f32 %v555_v2, %v326_v3 }
 0x2d8   :  { %v328_v6 = vmul.f32 0.5, %v327_v4  ;;  %v483_v4 = vld [vmem:[%s842_s1] sm:$0xff] }
 0x2da   :  { %v329_v7 = vsub.f32 1.5, %v328_v6 }
 0x2dc   :  { %v330_v8 = vmul.f32 %v555_v2, %v329_v7  ;;  %v460_v38 = vpop.permute.xlu1 %459 }
 0x2de   :  { %v334_v12 = vsel %vm333_vm15, %v555_v2, %v330_v8 }
 0x2df   :  { %v335_v13 = vmul.f32 %v334_v12, %v322_v10  ;;  %v336_v14 = vmul.f32 %v334_v12, %v323_v11 }
 0x2e1   :  { %v341_v16 = vmul.f32 %v339_v5, %v335_v13  ;;  %v342_v17 = vmul.f32 %v339_v5, %v336_v14  ;;  %v484_v5 = vld [vmem:[%s842_s1 + $0x8] sm:$0xff] }
 0x2e3   :  { %v347_v18 = vadd.f32 %v345_v15, %v341_v16  ;;  %v348_v19 = vadd.f32 %v345_v15, %v342_v17 }
 0x2e5   :  { %v349_v20 = vmax.f32 %v347_v18, 0.0  ;;  %v350_v21 = vmax.f32 %v348_v19, 0.0 }
 0x2e7   :  { %373 = vmatpush.msrb.mxu0 %v349_v20  ;;  %396 = vmatpush.msrb.mxu1 %v350_v21 }
 0x2e8   :  { %519 = vmatmul.msk.f32.vlgmr.msrb.gmra.mxu0 %vm351_vm0, %v76_v22  ;;  %521 = vmatmul.msk.f32.vlgmr.msrb.gmra.mxu1 %vm351_vm0, %v76_v22 }
 0x2f0   :  { %520 = vmatmul.msk.f32.gmra.mxu0 %vm351_vm0, %v77_v23  ;;  %522 = vmatmul.msk.f32.gmra.mxu1 %vm351_vm0, %v77_v23 }
 0x365   :  { %v375_v25 = vpop.f32.mrf.mxu0  ;;  %v398_v26 = vpop.f32.mrf.mxu1 }
 0x366   :  { %v404_v27 = vadd.f32 %v398_v26, %v375_v25  ;;  %v410_v28 = vmul.f32 %v375_v25, %v375_v25  ;;  %v411_v29 = vmul.f32 %v398_v26, %v398_v26 }
 0x368   :  { %405 = vadd.xlane.f32.xlu0 %v404_v27  ;;  %v414_v30 = vadd.f32 %v411_v29, %v410_v28 }
 0x36a   :  { %415 = vadd.xlane.f32.xlu1 %v414_v30 }
 0x36d   :  { %v807_v31 = vpop.f32.mrf.mxu0  ;;  %v809_v32 = vpop.f32.mrf.mxu1 }
 0x36e   :  { %v407_v33 = vadd.f32 %v809_v32, %v807_v31  ;;  %v412_v34 = vmul.f32 %v807_v31, %v807_v31  ;;  %v413_v35 = vmul.f32 %v809_v32, %v809_v32 }
 0x370   :  { %408 = vadd.xlane.f32.xlu2 %v407_v33  ;;  %v417_v36 = vadd.f32 %v413_v35, %v412_v34 }
 0x378   :  { %418 = vadd.xlane.f32.xlu2 %v417_v36 }
 0x37c   :  { %476 = vperm.xlu0 %549, %v73_v37  }
 0x383   :  { %472 = vperm.xlu1 %548, %v742_v9  }
 0x390   :  { %464 = vperm.xlu2 %547, %v73_v37  }
 0x3db   :  { %v406_v39 = vpop.xlane.xlu0 %405 }
 0x3dc   :  { %v420_v40 = vmul.f32 0.00390625, %v406_v39 }
 0x3dd   :  { %v416_v41 = vpop.xlane.xlu1 %415 }
 0x3de   :  { %v424_v42 = vmul.f32 %v420_v40, %v420_v40  ;;  %v422_v43 = vmul.f32 0.00390625, %v416_v41  ;;  %v428_v58 = vsub.f32 %v375_v25, %v420_v40  ;;  %v429_v59 = vsub.f32 %v398_v26, %v420_v40  ;;  %v486_v25 = vld [vmem:[%s842_s1 + $0x18] sm:$0xff] }
 0x3e0   :  { %v426_v44 = vsub.f32 %v422_v43, %v424_v42 }
 0x3e2   :  { %v432_v45 = vadd.f32 1e-05, %v426_v44 }
 0x3e3   :  { %v409_v47 = vpop.xlane.xlu2 %408 }
 0x3e4   :  { %556 = vrsqrt.f32 %v432_v45  ;;  %v421_v48 = vmul.f32 0.00390625, %v409_v47  ;;  %vm440_vm2 = vweird.f32 %v432_v45 }
 0x3e6   :  { %v425_v51 = vmul.f32 %v421_v48, %v421_v48  ;;  %v430_v15 = vsub.f32 %v807_v31, %v421_v48  ;;  %v431_v16 = vsub.f32 %v809_v32, %v421_v48 }
 0x3ea   :  { %v557_v49 = vpop.eup %556 }
 0x3eb   :  { %v435_v46 = vmul.f32 %v557_v49, %v432_v45  ;;  %v419_v50 = vpop.xlane.xlu2 %418  ;;  %vm441_vm1 = vweird.f32 %v557_v49 }
 0x3ec   :  { %v423_v52 = vmul.f32 0.00390625, %v419_v50  ;;  %vm442_vm3 = vmor %vm440_vm2, %vm441_vm1 }
 0x3ed   :  { %v436_v53 = vmul.f32 %v557_v49, %v435_v46 }
 0x3ee   :  { %v427_v54 = vsub.f32 %v423_v52, %v425_v51  ;;  %v477_v21 = vpop.permute.xlu0 %476 }
 0x3ef   :  { %v437_v9 = vmul.f32 0.5, %v436_v53 }
 0x3f0   :  { %v433_v55 = vadd.f32 1e-05, %v427_v54 }
 0x3f1   :  { %v438_v56 = vsub.f32 1.5, %v437_v9 }
 0x3f2   :  { %558 = vrsqrt.f32 %v433_v55  ;;  %vm450_vm5 = vweird.f32 %v433_v55 }
 0x3f3   :  { %v439_v57 = vmul.f32 %v557_v49, %v438_v56  ;;  %v465_v18 = vpop.permute.xlu2 %464 }
 0x3f5   :  { %v443_v60 = vsel %vm442_vm3, %v557_v49, %v439_v57  ;;  %v473_v63 = vpop.permute.xlu1 %472 }
 0x3f6   :  { %v454_v61 = vmul.f32 %v443_v60, %v428_v58  ;;  %v455_v62 = vmul.f32 %v443_v60, %v429_v59 }
 0x3f8   :  { %v559_v0 = vpop.eup %558  ;;  %v467_v1 = vmul.f32 %v460_v38, %v454_v61  ;;  %v468_v2 = vmul.f32 %v460_v38, %v455_v62 }
 0x3f9   :  { %v445_v3 = vmul.f32 %v559_v0, %v433_v55  ;;  %vm451_vm4 = vweird.f32 %v559_v0 }
 0x3fa   :  { %v479_v6 = vadd.f32 %v473_v63, %v467_v1  ;;  %v480_v7 = vadd.f32 %v473_v63, %v468_v2  ;;  %vm452_vm6 = vmor %vm450_vm5, %vm451_vm4 }
 0x3fb   :  { %v446_v8 = vmul.f32 %v559_v0, %v445_v3 }
 0x3fc   :  { %v487_v10 = vadd.f32 %v483_v4, %v479_v6  ;;  %v488_v11 = vadd.f32 %v484_v5, %v480_v7 }
 0x3fd   :  { %v447_v12 = vmul.f32 0.5, %v446_v8 }
 0x3fe   :  { %491 = vst [vmem:[#allocation8] sm:$0xff] %v487_v10 }
 0x3ff   :  { %492 = vst [vmem:[#allocation8 + $0x8] sm:$0xff] %v488_v11  ;;  %v448_v13 = vsub.f32 1.5, %v447_v12 }
 0x401   :  { %v449_v14 = vmul.f32 %v559_v0, %v448_v13 }
 0x403   :  { %v453_v17 = vsel %vm452_vm6, %v559_v0, %v449_v14 }
 0x404   :  { %v456_v19 = vmul.f32 %v453_v17, %v430_v15  ;;  %v457_v20 = vmul.f32 %v453_v17, %v431_v16 }
 0x406   :  { %v469_v22 = vmul.f32 %v465_v18, %v456_v19  ;;  %v470_v23 = vmul.f32 %v465_v18, %v457_v20 }
 0x408   :  { %v481_v26 = vadd.f32 %v477_v21, %v469_v22  ;;  %v482_v27 = vadd.f32 %v477_v21, %v470_v23 }
 0x40a   :  { %v489_v28 = vadd.f32 %v485_v24, %v481_v26  ;;  %v490_v29 = vadd.f32 %v486_v25, %v482_v27 }
 0x40c   :  { %493 = vst [vmem:[#allocation8 + $0x10] sm:$0xff] %v489_v28 }
 0x40d   :  { %494 = vst [vmem:[#allocation8 + $0x18] sm:$0xff] %v490_v29 }
 0x40e   :  { %507 = dma.vmem_to_hbm [thread:$0]  %s500_s15, 512, %s502_s17, [#allocation4], %s663_s9, %s663_s9, %s664_s10  }
 0x40f   :  { %660 = dma.done.wait [#allocation4], 512  }
 0x410   :  { %661 = vsyncadd [#allocation4], 4294966784 }
 0x411   :  { %512 = vsyncpa [#allocation3], 1 }
 0x412   :  { %513 = vsyncpa [#allocation6], 1 }
 0x413   :  { %514 = vsyncpa [#allocation4], 1 }

</bundles_post_ra>
